<compile_context>
chip_gen: v5e
topology: v5e:2x2
jax: 0.10.0
libtpu: 0.0.40
codegen_flags: <defaults>
</compile_context>

<pallas_src>
import functools

import jax
import jax.numpy as jnp
import numpy as np
from jax.experimental import pallas as pl
from jax.experimental.pallas import tpu as pltpu


# ----------------------------------------------------------------------------
# Kernel
# ----------------------------------------------------------------------------
def _up_conv_kernel(x_ref, halo_ref, wt_ref, wb_ref, b_ref, o_ref,
                    *, tile_t, seq_len, next_shift):
    x = x_ref[...]                                        # (TT, Cin)

    # Build the "next row" tile entirely in vregs:
    #   nxt[r]      = x[r + 1]            for r < TT-1   (XLU sublane rotation)
    #   nxt[TT-1]   = halo row            (first row of the next T-tile)
    # and zero it on the final sequence row (t == T-1), which is exactly where
    # ConvTranspose1d sees the implicit zero pad x[b, T] == 0.
    # The shift runs in f32 so sub-32-bit packing never hits the rotation.
    x32 = x.astype(jnp.float32)
    if tile_t > 1:
        rolled = pltpu.roll(x32, shift=next_shift, axis=0)
    else:
        rolled = x32
    row = jax.lax.broadcasted_iota(jnp.int32, x32.shape, 0)       # in-tile row
    nxt = jnp.where(row == tile_t - 1, halo_ref[0].astype(jnp.float32), rolled)
    t_idx = pl.program_id(1) * tile_t + row                        # global t
    nxt = jnp.where(t_idx == seq_len - 1, 0.0, nxt).astype(x.dtype)

    # Fused lane-dense [even | odd | pad] slab, bias added once:
    #   even = x @ W1, odd = x @ W2 + x_next @ W0.
    o_ref[...] = (
        jnp.dot(x, wt_ref[...], preferred_element_type=jnp.float32)
        + jnp.dot(nxt, wb_ref[...], preferred_element_type=jnp.float32)
        + b_ref[...]
    )


# ----------------------------------------------------------------------------
# Roll-direction probe (one tiny kernel, cached): guarantees the "next row"
# shift is correct regardless of rotation-direction convention.
# ----------------------------------------------------------------------------
def _roll_probe_kernel(x_ref, o_ref):
    o_ref[...] = pltpu.roll(x_ref[...], shift=1, axis=0)


@functools.lru_cache(maxsize=1)
def _roll_is_jnp_like():
    x = jnp.broadcast_to(jnp.arange(8, dtype=jnp.float32)[:, None], (8, 128))
    out = pl.pallas_call(
        _roll_probe_kernel,
        out_shape=jax.ShapeDtypeStruct((8, 128), jnp.float32),
    )(x)
    # jnp.roll(x, 1, axis=0)[0] == x[-1] == 7.
    return bool(np.asarray(out)[0, 0] == 7.0)


# ----------------------------------------------------------------------------
# VMEM-aware tile picking
# ----------------------------------------------------------------------------
def _vmem_capacity_bytes():
    try:
        return int(pltpu.get_tpu_info().vmem_capacity_bytes)
    except Exception:
        return 64 * 1024 * 1024          # conservative (v7x-sized) fallback


def _pick_tile_t(T, cin, wp, x_bytes, vmem_cap, row_align):
    # Resident operands (conservatively assume 2 pipeline buffers each):
    # packed W_top + W_bot, bias, halo row.
    resident = 2 * (2 * cin * wp * x_bytes + wp * 4 + cin * x_bytes)
    # Bytes per tile row: x tile (2 buffers) + padded output slab (2 buffers)
    # + ~1 tile of f32 temporaries (rolled / nxt).
    per_row = 2 * cin * x_bytes + 2 * wp * 4 + cin * 4 + wp * 4
    budget = int(vmem_cap * 0.55) - resident
    cap = 4096 if vmem_cap >= (96 << 20) else 2048   # bigger tiles on 128 MiB parts
    tile = budget // per_row if budget > per_row * row_align else row_align
    tile = max(row_align, min(cap, tile))
    tile = (tile // row_align) * row_align
    return T if tile >= T else max(row_align, tile)


# ----------------------------------------------------------------------------
# Wrapper
# ----------------------------------------------------------------------------
def masked_up_conv(x, mask, weight, bias, *, tile_t=None, use_bf16=False):
    """x: (B, T, Cin) f32, mask: (B, T), weight: (Cin, Cout, 3) (ConvTranspose1d
    layout), bias: (Cout,).  Returns (y: (B, 2T, Cout), mask_out: (B, 2T))."""
    B, T, Cin = x.shape
    Cout = weight.shape[1]
    two_cout = 2 * Cout
    Wp = ((two_cout + 127) // 128) * 128          # lane-dense padded slab width
    pad = Wp - two_cout

    in_dtype = jnp.bfloat16 if use_bf16 else jnp.float32
    x_bytes = 2 if use_bf16 else 4
    row_align = 16 if use_bf16 else 8
    vmem_cap = _vmem_capacity_bytes()

    if tile_t is None:
        tile_t = _pick_tile_t(T, Cin, Wp, x_bytes, vmem_cap, row_align)
    tile_t = int(tile_t)
    tile_t = T if tile_t >= T else max(1, tile_t)
    n_t = pl.cdiv(T, tile_t)
    next_shift = ((tile_t - 1) if _roll_is_jnp_like() else 1) if tile_t > 1 else 0

    x_in = x.astype(in_dtype)

    # One-row halo per (batch, T-tile): x[b, (j+1)*tile_t] (clamped at the
    # sequence end; the clamped row only feeds t == T-1, which is zeroed).
    # Kept (B*n_t, 1, Cin) so the blocked last-two dims equal the full dims.
    halo_t = jnp.minimum((jnp.arange(n_t, dtype=jnp.int32) + 1) * tile_t, T - 1)
    halo = x_in[:, halo_t, :].reshape(B * n_t, 1, Cin)

    # Pack taps: out = x @ [W1|W2|0] + x_next @ [0|W0|0] + [bias|bias|0].
    w0, w1, w2 = weight[:, :, 0], weight[:, :, 1], weight[:, :, 2]
    w_top = jnp.concatenate([w1, w2], axis=1)
    w_bot = jnp.concatenate([jnp.zeros_like(w0), w0], axis=1)
    b_big = jnp.concatenate([bias, bias])
    if pad:
        w_top = jnp.pad(w_top, ((0, 0), (0, pad)))
        w_bot = jnp.pad(w_bot, ((0, 0), (0, pad)))
        b_big = jnp.pad(b_big, (0, pad))
    w_top = w_top.astype(in_dtype)
    w_bot = w_bot.astype(in_dtype)
    b_big = b_big.reshape(1, Wp).astype(jnp.float32)

    cost = pl.CostEstimate(
        # Counts the padded-width matmuls (upper bound on the algorithmic
        # 6*B*T*Cin*Cout).
        flops=2 * B * T * Cin * (2 * Wp),
        transcendentals=0,
        bytes_accessed=(x_in.size * x_bytes + halo.size * x_bytes
                        + (w_top.size + w_bot.size) * x_bytes
                        + b_big.size * 4 + B * T * Wp * 4),
    )

    vmem_limit = min(int(vmem_cap * 0.75), 96 * 1024 * 1024)

    out3 = pl.pallas_call(
        functools.partial(_up_conv_kernel, tile_t=tile_t, seq_len=T,
                          next_shift=next_shift),
        out_shape=jax.ShapeDtypeStruct((B, T, Wp), jnp.float32),
        grid=(B, n_t),
        in_specs=[
            pl.BlockSpec((None, tile_t, Cin), lambda b, j: (b, j, 0)),   # x tile
            pl.BlockSpec((1, 1, Cin), lambda b, j: (b * n_t + j, 0, 0)),  # halo
            pl.BlockSpec((Cin, Wp), lambda b, j: (0, 0)),                # W_top
            pl.BlockSpec((Cin, Wp), lambda b, j: (0, 0)),                # W_bot
            pl.BlockSpec((1, Wp), lambda b, j: (0, 0)),                  # bias
        ],
        out_specs=pl.BlockSpec((None, tile_t, Wp), lambda b, j: (b, j, 0)),
        compiler_params=pltpu.CompilerParams(
            dimension_semantics=("parallel", "parallel"),
            vmem_limit_bytes=vmem_limit,
        ),
        cost_estimate=cost,
    )(x_in, halo, w_top, w_bot, b_big)

    # (B, T, [even|odd|pad]) -> drop pad -> (B, 2T, Cout): contiguous reshape.
    y = out3[:, :, :two_cout] if pad else out3
    y = y.reshape(B, 2 * T, Cout)

    # mask: torch.stack([mask, mask], dim=2).reshape(B, -1)
    mask_out = jnp.stack([mask, mask], axis=2).reshape(B, -1)
    return y, mask_out


# ----------------------------------------------------------------------------
# Pure-JAX reference (matches the PyTorch module)
# ----------------------------------------------------------------------------
def _reference(x, mask, weight, bias):
    B, T, Cin = x.shape
    Cout = weight.shape[1]
    L = 2 * (T - 1) + 3
    y = jnp.zeros((B, Cout, L), dtype=jnp.float32)
    x_ncl = jnp.transpose(x, (0, 2, 1))  # (B, Cin, T)
    for k in range(3):
        contrib = jnp.einsum('bct,co->bot', x_ncl, weight[:, :, k])
        y = y.at[:, :, k:k + 2 * T:2].add(contrib)
    y = y + bias[None, :, None]
    y = jnp.transpose(y, (0, 2, 1))[:, 1:, :]
    mask_out = jnp.stack([mask, mask], axis=2).reshape(B, -1)
    return y, mask_out


if __name__ == "__main__":
    key = jax.random.PRNGKey(0)
    B, T, Cin, Cout = 2, 16, 8, 16

    kx, km, kw, kb = jax.random.split(key, 4)
    x = jax.random.normal(kx, (B, T, Cin), dtype=jnp.float32)
    mask = (jax.random.uniform(km, (B, T)) > 0.5).astype(jnp.float32)
    # ConvTranspose1d weight shape: (in_chan, out_chan, kernel_size=3)
    weight = jax.random.normal(kw, (Cin, Cout, 3), dtype=jnp.float32) * 0.1
    bias = jax.random.normal(kb, (Cout,), dtype=jnp.float32) * 0.1

    y_ref, m_ref = _reference(x, mask, weight, bias)

    # Multi-tile path: exercises the cross-tile halo, the XLU roll and the
    # sequence-end tap zeroing in the last tile.
    y_tiled, m_tiled = masked_up_conv(x, mask, weight, bias, tile_t=8)
    # Auto tile size (single tile covering T at this toy size).
    y_auto, m_auto = masked_up_conv(x, mask, weight, bias)
    jax.block_until_ready((y_tiled, y_auto))

    for y_out, m_out in ((y_tiled, m_tiled), (y_auto, m_auto)):
        np.testing.assert_allclose(np.asarray(y_out), np.asarray(y_ref),
                                   rtol=1e-5, atol=1e-5)
        np.testing.assert_array_equal(np.asarray(m_out), np.asarray(m_ref))
        assert y_out.shape == (B, 2 * T, Cout) and m_out.shape == (B, 2 * T)

    # Optional bf16-operand path (v6e/v7x MXU), f32 accumulation: looser tol.
    y_bf16, m_bf16 = masked_up_conv(x, mask, weight, bias, use_bf16=True)
    jax.block_until_ready(y_bf16)
    np.testing.assert_allclose(np.asarray(y_bf16), np.asarray(y_ref),
                               rtol=5e-2, atol=5e-2)
    np.testing.assert_array_equal(np.asarray(m_bf16), np.asarray(m_ref))

    print("KERNEL_OK")
</pallas_src>

<mosaic_0001>
module attributes {stable_mosaic.version = 11 : i64} {
  func.func @_roll_probe_kernel(%arg0: memref<8x128xf32, #tpu.memory_space<vmem>>, %arg1: memref<8x128xf32, #tpu.memory_space<vmem>>) attributes {dimension_semantics = [], scalar_prefetch = 0 : i64, scratch_operands = 0 : i64, tpu.core_type = #tpu.core_type<tc>} {
    %c0 = arith.constant 0 : index
    %c0_0 = arith.constant 0 : index
    %0 = vector.load %arg0[%c0, %c0_0] : memref<8x128xf32, #tpu.memory_space<vmem>>, vector<8x128xf32>
    %c1_i32 = arith.constant 1 : i32
    %1 = tpu.dynamic_rotate %0 by %c1_i32 dim 0 : vector<8x128xf32>, i32 -> vector<8x128xf32>
    %c0_1 = arith.constant 0 : index
    %c0_2 = arith.constant 0 : index
    %2 = vector.load %arg1[%c0_1, %c0_2] : memref<8x128xf32, #tpu.memory_space<vmem>>, vector<8x128xf32>
    tpu.vector_store %arg1[%c0_1, %c0_2], %1 {strides = array<i32>} : memref<8x128xf32, #tpu.memory_space<vmem>>, vector<8x128xf32>,
    return
  }
}

</mosaic_0001>

<bundles_post_ra>
// kernel: tpu_custom_call.1
= control target key start
LH: loop header
LB: loop body
LE: loop exit
PB: predicated region body
PF: predicated region fallthrough
CT: control target
= control target key end

     0   :  { %6 = vsyncpa [#allocation3], 0  ;;  %s115_s0 = inlined_call_operand.hbm [shape: f32[8,128], index: 0, kind: input, shape index: {}]   ;;  %s116_s1 = inlined_call_operand.hbm [shape: f32[8,128], index: 1, kind: output, shape index: {}]  }
   0x1   :  { %7 = vsyncpa [#allocation4], 0  ;;  %s13_s8 = sshll.u32 %s115_s0, 4  ;;  %s97_s9 = smov [#allocation2]   ;;  %s14_s8 = int_to_ptr.hbm [resolvable:$true] %s13_s8 }
   0x2   :  { %s15_s10 = sshll.u32 %s97_s9, 4  ;;  %s16_s10 = int_to_ptr.vmem [resolvable:$true] %s15_s10 }
   0x3   :  { %18 = dma.hbm_to_vmem [thread:$0]  %s14_s8, 128, %s16_s10, [#allocation3]  }
   0x4   :  { %93 = dma.done.wait [#allocation3], 128  }
   0x5   :  { %94 = vsyncadd [#allocation3], 4294967168  ;;  %s98_s11 = smov [#allocation5]   ;;  %s33_s15 = sshll.u32 %s116_s1, 4  ;;  %v23_v0 = vld [vmem:[#allocation2] sm:$0xff]  ;;  %s34_s15 = int_to_ptr.hbm [resolvable:$true] %s33_s15 }
   0x6   :  { %s31_s12 = sshll.u32 %s98_s11, 4  ;;  %v24_v1 = vrot.slane %v23_v0, 7  ;;  %s32_s12 = int_to_ptr.vmem [resolvable:$true] %s31_s12 }
   0x8   :  { %25 = vst [vmem:[#allocation5] sm:$0xff] %v24_v1 }
   0x9   :  { %36 = dma.vmem_to_hbm [thread:$0]  %s32_s12, 128, %s34_s15, [#allocation4]  }
   0xa   :  { %95 = dma.done.wait [#allocation4], 128  }
   0xb   :  { %96 = vsyncadd [#allocation4], 4294967168 }
   0xc   :  { %41 = vsyncpa [#allocation3], 1 }
   0xd   :  { %42 = vsyncpa [#allocation4], 1 }

</bundles_post_ra>
